<compile_context>
chip_gen: v7x
topology: tpu7x:2x2x1
jax: 0.10.0
libtpu: 0.0.40
codegen_flags: <defaults>
</compile_context>

<pallas_src>
import functools

import numpy as np
import jax
import jax.numpy as jnp
from jax.experimental import pallas as pl
from jax.experimental.pallas import tpu as pltpu

_LANE = 128     # lane width (last-dim tiling quantum)
_SUBLANE = 8    # sublane width (second-to-last-dim tiling quantum)


def _round_up(x, m):
    return (x + m - 1) // m * m


def _linear_kernel(x_ref, w_ref, b_ref, o_ref):
    # x_ref : [tile_rows, K]   packed input rows (K = pack*M, lane-dense)
    # w_ref : [K, K]           block-diagonal W^T (VMEM-resident across grid)
    # b_ref : [1, K]           pack-tiled bias (broadcast over rows)
    # o_ref : [tile_rows, K]   lane-dense output (unmasked 128-wide stores)
    y = jnp.dot(x_ref[...], w_ref[...], preferred_element_type=jnp.float32)
    o_ref[...] = (y + b_ref[...]).astype(o_ref.dtype)


def prepare_params(w, b):
    """One-time parameter prep (init time, NOT per forward call).

    If the feature dim M divides the 128-lane width, packs `pack = 128 // M`
    logical rows per physical 128-lane row: returns a [128, 128]
    block-diagonal W^T and a [1, 128] tiled bias.  Otherwise returns plain
    W^T / bias (pack == 1).
    """
    w = jnp.asarray(w)
    b = jnp.asarray(b)
    M_out, M_in = w.shape
    assert M_out == M_in, "MutationModel2 uses a square Linear(M, M)"
    M = M_out
    pack = _LANE // M if (M <= _LANE and _LANE % M == 0) else 1
    wt = w.T
    if pack == 1:
        return wt, b.reshape(1, M)
    K = pack * M
    w_packed = jnp.zeros((K, K), w.dtype)
    for p in range(pack):
        w_packed = w_packed.at[p * M:(p + 1) * M, p * M:(p + 1) * M].set(wt)
    b_packed = jnp.tile(b, pack).reshape(1, K)
    return w_packed, b_packed


@functools.partial(jax.jit, static_argnames=("row_tile",))
def mutation_model2_forward(x, w_packed, b_packed, *, row_tile=2048):
    """Device-only hot path: y = x @ W^T + b (params prepped by prepare_params)."""
    B, M = x.shape
    K = w_packed.shape[0]
    pack = K // M

    packed = (pack > 1) and (B % pack == 0)
    if packed:
        xr = x.reshape(B // pack, K)      # free: rows are contiguous in HBM
        wk, bk = w_packed, b_packed
    else:
        # Fallback (B not a multiple of pack, or M not packable): plain GEMM
        # against the first diagonal block, which is exactly W^T.
        xr = x
        wk = w_packed[:M, :M]
        bk = b_packed[:, :M]

    rows, feat = xr.shape
    out_shape = jax.ShapeDtypeStruct((rows, feat), x.dtype)

    # Row tile: a multiple of 8 (sublane), capped by row_tile.
    tile = _round_up(min(row_tile, rows), _SUBLANE)

    if rows <= tile:
        # Whole problem fits in one VMEM tile: grid-free call, no pipeline
        # prologue/epilogue or double-buffer allocation.
        y = pl.pallas_call(
            _linear_kernel,
            out_shape=out_shape,
            in_specs=[pl.BlockSpec(memory_space=pltpu.MemorySpace.VMEM)] * 3,
            out_specs=pl.BlockSpec(memory_space=pltpu.MemorySpace.VMEM),
        )(xr, wk, bk)
    else:
        # Batched: grid over row tiles; weight & bias blocks are constant so
        # they stay VMEM-resident across the whole grid.  A ragged last block
        # (rows % tile != 0) is handled by Pallas's out-of-bounds masking.
        n_tiles = pl.cdiv(rows, tile)
        y = pl.pallas_call(
            _linear_kernel,
            out_shape=out_shape,
            grid=(n_tiles,),
            in_specs=[
                pl.BlockSpec((tile, feat), lambda i: (i, 0)),
                pl.BlockSpec((feat, feat), lambda i: (0, 0)),
                pl.BlockSpec((1, feat), lambda i: (0, 0)),
            ],
            out_specs=pl.BlockSpec((tile, feat), lambda i: (i, 0)),
            compiler_params=pltpu.CompilerParams(
                dimension_semantics=("parallel",),  # shards across v7x's 2 TCs
            ),
        )(xr, wk, bk)

    if packed:
        y = y.reshape(B, M)                # free: inverse of the input reshape
    return y


def mutation_model2_module_forward(x, w_packed, b_packed):
    """Mirrors MutationModel2.forward: returns (y, y_as_numpy).

    The numpy conversion forces a device->host sync, exactly like PyTorch's
    `x.data.numpy()`; keep it OUT of hot loops (use mutation_model2_forward
    directly there).
    """
    y = mutation_model2_forward(x, w_packed, b_packed)
    y_np = np.asarray(jax.device_get(y))
    return y, y_np


def init_params(M, key):
    """torch.nn.Linear default init: U[-1/sqrt(M), 1/sqrt(M)]."""
    kw, kb = jax.random.split(key)
    bound = 1.0 / np.sqrt(M)
    w = jax.random.uniform(kw, (M, M), jnp.float32, minval=-bound, maxval=bound)
    b = jax.random.uniform(kb, (M,), jnp.float32, minval=-bound, maxval=bound)
    return w, b


if __name__ == "__main__":
    M = 32   # number of mutation types
    B = 8    # small batch of feature vectors (module-native size)

    key = jax.random.PRNGKey(0)
    kx, kp, kbig = jax.random.split(key, 3)
    x = jax.random.normal(kx, (B, M), jnp.float32)
    w, b = init_params(M, kp)

    w_packed, b_packed = prepare_params(w, b)   # one-time prep (128x128 block-diag)

    # 1) Small, module-faithful forward (packed rows, grid-free path).
    y, y_np = mutation_model2_module_forward(x, w_packed, b_packed)
    jax.block_until_ready(y)
    y_ref = x @ w.T + b
    np.testing.assert_allclose(np.asarray(y), np.asarray(y_ref), rtol=1e-5, atol=1e-5)
    np.testing.assert_allclose(y_np, np.asarray(y_ref), rtol=1e-5, atol=1e-5)

    # 2) Large batch: packed rows, gridded path with an even number of tiles.
    B_big = 16384                                  # rows = 4096 -> 2 tiles of 2048
    x_big = jax.random.normal(kbig, (B_big, M), jnp.float32)
    y_big = mutation_model2_forward(x_big, w_packed, b_packed)
    jax.block_until_ready(y_big)
    np.testing.assert_allclose(
        np.asarray(y_big), np.asarray(x_big @ w.T + b), rtol=1e-5, atol=1e-5)

    # 3) Ragged last tile (rows % tile != 0) handled without any pad/slice pass.
    B_rag = 16420                                  # rows = 4105 -> 3 tiles, last has 9 rows
    x_rag = jax.random.normal(kbig, (B_rag, M), jnp.float32)
    y_rag = mutation_model2_forward(x_rag, w_packed, b_packed)
    jax.block_until_ready(y_rag)
    np.testing.assert_allclose(
        np.asarray(y_rag), np.asarray(x_rag @ w.T + b), rtol=1e-5, atol=1e-5)

    # 4) Batch not divisible by the pack factor -> unpacked fallback path.
    B_odd = 10
    x_odd = jax.random.normal(kx, (B_odd, M), jnp.float32)
    y_odd = mutation_model2_forward(x_odd, w_packed, b_packed)
    jax.block_until_ready(y_odd)
    np.testing.assert_allclose(
        np.asarray(y_odd), np.asarray(x_odd @ w.T + b), rtol=1e-5, atol=1e-5)

    print("KERNEL_OK")
</pallas_src>

<mosaic_0001>
module attributes {stable_mosaic.version = 11 : i64} {
  func.func @_linear_kernel(%arg0: memref<2x128xf32, #tpu.memory_space<vmem>>, %arg1: memref<128x128xf32, #tpu.memory_space<vmem>>, %arg2: memref<1x128xf32, #tpu.memory_space<vmem>>, %arg3: memref<2x128xf32, #tpu.memory_space<vmem>>) attributes {dimension_semantics = [], scalar_prefetch = 0 : i64, scratch_operands = 0 : i64, tpu.core_type = #tpu.core_type<tc>} {
    %c0 = arith.constant 0 : index
    %c0_0 = arith.constant 0 : index
    %0 = vector.load %arg0[%c0, %c0_0] : memref<2x128xf32, #tpu.memory_space<vmem>>, vector<2x128xf32>
    %c0_1 = arith.constant 0 : index
    %c0_2 = arith.constant 0 : index
    %1 = vector.load %arg1[%c0_1, %c0_2] : memref<128x128xf32, #tpu.memory_space<vmem>>, vector<128x128xf32>
    %cst = arith.constant dense<0.000000e+00> : vector<2x128xf32>
    %2 = tpu.matmul %0, %1, %cst {dimension_numbers = #tpu.dot_dimension_numbers<[1], [0], [0], [1], [0, 0, 1, 1], [], []>} : vector<2x128xf32>, vector<128x128xf32>, vector<2x128xf32> -> vector<2x128xf32>
    %c0_3 = arith.constant 0 : index
    %c0_4 = arith.constant 0 : index
    %3 = vector.load %arg2[%c0_3, %c0_4] : memref<1x128xf32, #tpu.memory_space<vmem>>, vector<1x128xf32>
    %4 = vector.broadcast %3 : vector<1x128xf32> to vector<2x128xf32>
    %5 = arith.addf %2, %4 : vector<2x128xf32>
    %c0_5 = arith.constant 0 : index
    %c0_6 = arith.constant 0 : index
    %6 = vector.load %arg3[%c0_5, %c0_6] : memref<2x128xf32, #tpu.memory_space<vmem>>, vector<2x128xf32>
    tpu.vector_store %arg3[%c0_5, %c0_6], %5 {strides = array<i32>} : memref<2x128xf32, #tpu.memory_space<vmem>>, vector<2x128xf32>,
    return
  }
}

</mosaic_0001>

<bundles_post_ra>
// kernel: mutation_model2_forward.1
= control target key start
LH: loop header
LB: loop body
LE: loop exit
PB: predicated region body
PF: predicated region fallthrough
CT: control target
= control target key end

     0   :  { %8 = vsyncpa [#allocation3], 0  ;;  %s235_s12 = smov [#allocation2]   ;;  %s282_s0 = inlined_call_operand.vmem [shape: f32[2,128], index: 0, kind: input, shape index: {}]   ;;  %s283_s1 = inlined_call_operand.hbm [shape: f32[128,128], index: 1, kind: input, shape index: {}]   ;;  %s284_s2 = inlined_call_operand.vmem [shape: f32[1,128], index: 2, kind: input, shape index: {}]   ;;  %s285_s3 = inlined_call_operand.vmem [shape: f32[2,128], index: 3, kind: output, shape index: {}]  }
   0x1   :  { %s16_s13 = sshll.u32 %s235_s12, 4  ;;  %s211_s16 = scalar_lea.hbm %s283_s1, 2048  ;;  %s17_s13 = int_to_ptr.vmem [resolvable:$true] %s16_s13 }
   0x2   :  { %p212_p0 = scmp.ne.s32.totalorder %s283_s1, %s211_s16  ;;  %p215_p1 = scmp.lt.u32.totalorder %s211_s16, %s283_s1 }
   0x4   :  { %p217_p2 = pnand %p215_p1, %p212_p0 }
   0x6   :  { %220 = shalt.err (!%p217_p2)
}
   0x7   :  { %s221_s21 = scalar_lea.vmem %s17_s13, 2048  ;;  %p226_p4 = scmp.lt.s32.totalorder %s17_s13, %s17_s13 }
   0x8   :  { %p222_p3 = scmp.ne.s32.totalorder %s17_s13, %s221_s21  ;;  %p227_p5 = scmp.lt.s32.totalorder %s221_s21, %s221_s21 }
   0xa   :  { %p228_p6 = por %p227_p5, %p226_p4 }
   0xc   :  { %p229_p7 = pnand %p228_p6, %p222_p3 }
   0xe   :  { %232 = shalt.err (!%p229_p7)
}
   0xf   :  { %s236_s22 = smov 128   ;;  %s237_s23 = smov 8  }
  0x10   :  { %22 = dma.hbm_to_vmem [thread:$0]  %s283_s1, 2048, %s17_s13, [#allocation3], %s236_s22, %s236_s22, %s237_s23  }
  0x11   :  { %233 = dma.done.wait [#allocation3], 2048  }
  0x12   :  { %234 = vsyncadd [#allocation3], 4294965248  ;;  %v238_v0 = vmov 0.0|0.0   ;;  %vm239_vm0 = vmmov 0   ;;  %v240_v1 = vmov 0.0   ;;  %v29_v2 = vld [vmem:[#allocation2] sm:$0xff] }
  0x13   :  { %181 = vmatprep.subr.bf16.mxu0 %v238_v0  ;;  %178 = vmatprep.mubr.msk.f32.mxu0 %vm239_vm0, %v240_v1  ;;  %v30_v3 = vld [vmem:[#allocation2 + $0x8] sm:$0xff]  ;;  %v31_v4 = vld [vmem:[#allocation2 + $0x10] sm:$0xff]  ;;  %v32_v6 = vld [vmem:[#allocation2 + $0x18] sm:$0xff] }
  0x14   :  { %v182_v5 = vpack.c.bf16 %v30_v3, %v29_v2  ;;  %v185_v7 = vpack.c.bf16 %v32_v6, %v31_v4  ;;  %v33_v8 = vld [vmem:[#allocation2 + $0x20] sm:$0xff]  ;;  %v34_v9 = vld [vmem:[#allocation2 + $0x28] sm:$0xff]  ;;  %v35_v11 = vld [vmem:[#allocation2 + $0x30] sm:$0xff] }
  0x15   :  { %v188_v10 = vpack.c.bf16 %v34_v9, %v33_v8  ;;  %v36_v12 = vld [vmem:[#allocation2 + $0x38] sm:$0xff]  ;;  %v37_v14 = vld [vmem:[#allocation2 + $0x40] sm:$0xff]  ;;  %v38_v15 = vld [vmem:[#allocation2 + $0x48] sm:$0xff] }
  0x16   :  { %183 = vmatpush3.bf16.msra.mxu0 %v182_v5  ;;  %v191_v13 = vpack.c.bf16 %v36_v12, %v35_v11  ;;  %v194_v16 = vpack.c.bf16 %v38_v15, %v37_v14  ;;  %v39_v17 = vld [vmem:[#allocation2 + $0x50] sm:$0xff]  ;;  %v40_v18 = vld [vmem:[#allocation2 + $0x58] sm:$0xff]  ;;  %v41_v20 = vld [vmem:[#allocation2 + $0x60] sm:$0xff] }
  0x17   :  { %184 = vmatprep.subr.bf16.mxu0 %v238_v0  ;;  %v197_v19 = vpack.c.bf16 %v40_v18, %v39_v17  ;;  %v42_v21 = vld [vmem:[#allocation2 + $0x68] sm:$0xff]  ;;  %v43_v23 = vld [vmem:[#allocation2 + $0x70] sm:$0xff]  ;;  %v44_v24 = vld [vmem:[#allocation2 + $0x78] sm:$0xff] }
  0x18   :  { %v200_v22 = vpack.c.bf16 %v42_v21, %v41_v20  ;;  %v203_v25 = vpack.c.bf16 %v44_v24, %v43_v23  ;;  %v28_v26 = vld [vmem:[%s282_s0] sm:$0x3] }
  0x19   :  { %v128_v27 = vld [vmem:[%s284_s2] ss:$0 sm:$0xff] }
  0x1a   :  { %186 = vmatpush3.bf16.msra.mxu0 %v185_v7 }
  0x1b   :  { %187 = vmatprep.subr.bf16.mxu0 %v238_v0 }
  0x1e   :  { %189 = vmatpush3.bf16.msra.mxu0 %v188_v10 }
  0x1f   :  { %190 = vmatprep.subr.bf16.mxu0 %v238_v0 }
  0x22   :  { %192 = vmatpush3.bf16.msra.mxu0 %v191_v13 }
  0x23   :  { %193 = vmatprep.subr.bf16.mxu0 %v238_v0 }
  0x26   :  { %195 = vmatpush3.bf16.msra.mxu0 %v194_v16 }
  0x27   :  { %196 = vmatprep.subr.bf16.mxu0 %v238_v0 }
  0x2a   :  { %198 = vmatpush3.bf16.msra.mxu0 %v197_v19 }
  0x2b   :  { %199 = vmatprep.subr.bf16.mxu0 %v238_v0 }
  0x2e   :  { %201 = vmatpush3.bf16.msra.mxu0 %v200_v22 }
  0x2f   :  { %202 = vmatprep.subr.bf16.mxu0 %v238_v0 }
  0x32   :  { %204 = vmatpush3.bf16.msra.mxu0 %v203_v25 }
  0x35   :  { %179 = vmatmul.mubr.f32.vlgmr.msra.gmra.mrb[0].mxu0 %v28_v26 }
 0x108   :  { %v118_v28 = vpop.f32.mrb[0].mxu0 }
 0x109   :  { %v119_v29 = vadd.f32 %v128_v27, %v118_v28  ;;  %v180_v30 = vpop.f32.mrb[1].mxu0 }
 0x10b   :  { %122 = vst [vmem:[%s285_s3] sm:$0x3] %v119_v29 }
 0x10c   :  { %127 = vsyncpa [#allocation3], 1 }

</bundles_post_ra>
